<compile_context>
chip_gen: v7x
topology: tpu7x:2x2x1
jax: 0.10.0
libtpu: 0.0.40
codegen_flags: <defaults>
</compile_context>

<pallas_src>
import functools

import jax
import jax.numpy as jnp
from jax import lax
from jax.experimental import pallas as pl
from jax.experimental.pallas import tpu as pltpu

EPS_NORM = 1e-12   # F.normalize eps
EPS_BN = 1e-5      # BatchNorm2d eps

MAX_BT = 8         # bound on the per-batch unroll inside the kernel


# ---------------------------------------------------------------------------
# Pallas kernel
# ---------------------------------------------------------------------------

def fau_layer_kernel(x_ref, wbig_ref, b1_ref, b2_ref, wup_ref, bup_ref, out_ref,
                     *, inter, lat, bt, hw_pad, hw_valid):
    cdtype = wbig_ref.dtype                     # matmul input dtype (bf16 or f32)
    eps2 = jnp.float32(EPS_NORM * EPS_NORM)

    x = x_ref[...]                              # (C, N) f32, N = bt*hw_pad

    # Single fused 1x1-conv stage (BN scales + phi-composition folded at prep time):
    #   rows [0:inter)          -> q  (f_query, BN-scaled; bias in b1)
    #   rows [inter:2*inter)    -> k  (f_key,   BN-scaled; bias in b1)
    #   rows [2i:2i+lat)        -> raw phi(k)   (needs per-pixel 1/||k|| scale)
    #   rows [2i+lat:2i+2*lat)  -> raw phi'(q)  (needs per-pixel 1/||q|| scale)
    acts = jnp.dot(wbig_ref[...], x.astype(cdtype),
                   preferred_element_type=jnp.float32) + b1_ref[...]
    q = acts[:inter, :]
    k = acts[inter:2 * inter, :]
    pk_raw = acts[2 * inter:2 * inter + lat, :]
    pq_raw = acts[2 * inter + lat:, :]

    # per-pixel L2 normalization over the channel dim:  v / max(||v||, eps)
    inv_q = lax.rsqrt(jnp.maximum(jnp.sum(q * q, axis=0, keepdims=True), eps2))
    inv_k = lax.rsqrt(jnp.maximum(jnp.sum(k * k, axis=0, keepdims=True), eps2))
    k_n = k * inv_k                             # normalized key (for latent contraction)

    # phi / phi' : the channel-dim conv commutes with the per-pixel column scale,
    # so the 1/||.|| factors are applied here, then BN bias + ReLU.
    b2 = b2_ref[...]                            # (2*lat, 1) f32
    phi_k = jnp.maximum(pk_raw * inv_k + b2[:lat, :], 0.0)    # (lat, N)
    phi_q = jnp.maximum(pq_raw * inv_q + b2[lat:, :], 0.0)    # (lat, N)

    # graph_adj_l2v: per-pixel L2 normalize phi_q over the latent-channel dim.
    adj_l2v = phi_q * lax.rsqrt(
        jnp.maximum(jnp.sum(phi_q * phi_q, axis=0, keepdims=True), eps2))

    # padding mask, hoisted out of the per-batch loop: zero padded pixels so they
    # do not leak into the spatial normalization / latent contraction.
    if hw_valid != hw_pad:
        col = lax.broadcasted_iota(jnp.int32, (1, bt * hw_pad), 1)
        mask = (col % hw_pad) < hw_valid
        k_n = jnp.where(mask, k_n, 0.0)
        phi_k = jnp.where(mask, phi_k, 0.0)

    wup = wup_ref[...]                          # (C, inter), BN scale + lambda_ folded
    bup = bup_ref[...]                          # (C, 1) f32

    # --- per-batch FAUKernel (latent aggregation must not mix batch elements) ---
    for b in range(bt):
        s0 = b * hw_pad
        k_b = k_n[:, s0:s0 + hw_pad]            # (inter, hw_pad)
        phi_k_b = phi_k[:, s0:s0 + hw_pad]      # (lat, hw_pad)

        # graph_adj_v2l: L2 normalize over the spatial dim.
        adj_v2l = phi_k_b * lax.rsqrt(
            jnp.maximum(jnp.sum(phi_k_b * phi_k_b, axis=1, keepdims=True), eps2))

        # latent_nodes = adj_v2l @ key^T   -> (lat, inter)
        latent = lax.dot_general(adj_v2l.astype(cdtype), k_b.astype(cdtype),
                                 (((1,), (1,)), ((), ())),
                                 preferred_element_type=jnp.float32)

        # normalized affinity + softmax.  Rows of ln are unit vectors, so the
        # logits are bounded in [-1, 1] -> max-subtraction is safe to skip.
        # Do NOT change the normalization without restoring the max-subtraction.
        ln = latent * lax.rsqrt(
            jnp.maximum(jnp.sum(latent * latent, axis=1, keepdims=True), eps2))
        aff = lax.dot_general(ln, ln, (((1,), (1,)), ((), ())),
                              preferred_element_type=jnp.float32)   # (lat, lat)
        e = jnp.exp(aff)
        aff = e * pl.reciprocal(jnp.sum(e, axis=-1, keepdims=True), approx=True)
        latent = jnp.dot(aff, latent, preferred_element_type=jnp.float32)

        # up_channel conv fused into the visible matmul:
        #   up = wup @ (latent^T @ adj_l2v) = (wup @ latent^T) @ adj_l2v
        wup_lat = lax.dot_general(wup, latent.astype(cdtype),
                                  (((1,), (1,)), ((), ())),
                                  preferred_element_type=jnp.float32)   # (C, lat)
        adj_b = adj_l2v[:, s0:s0 + hw_pad]
        up_b = jnp.dot(wup_lat.astype(cdtype), adj_b.astype(cdtype),
                       preferred_element_type=jnp.float32)              # (C, hw_pad)

        # residual (lambda_ already folded into wup / bup)
        out_ref[:, s0:s0 + hw_pad] = x[:, s0:s0 + hw_pad] + up_b + bup


# ---------------------------------------------------------------------------
# Wrapper / tiling
# ---------------------------------------------------------------------------

def _round_up(n, m):
    return (n + m - 1) // m * m


def _tpu_config():
    """(num_tensorcores, physical VMEM bytes) for the attached TPU generation."""
    try:
        kind = jax.devices()[0].device_kind.lower()
    except Exception:
        kind = ""
    if "v7" in kind:
        return 2, 64 * 2**20        # v7x: 2 TCs, 64 MiB VMEM per TC
    return 1, 128 * 2**20           # v5e / v6e: 1 TC, 128 MiB VMEM


def _per_column_bytes(C, inter, lat):
    # f32 bytes per lane column of one (C, bt*hw_pad) block, counting:
    # double-buffered in/out x (4C) + live x/out/up values (3C) + fused activation
    # slab (2i+2l) + k_n and bf16 cast copies (~2i) + phi_k/phi_q/adj_l2v (~4l)
    # + mask / misc slack (C).
    return 4 * (8 * C + 4 * inter + 6 * lat)


def _pick_batch_tile(B, hw_pad, per_col, budget_bytes, num_tc):
    # TODO(synk): if one batch element (hw_pad * per_col) exceeds the VMEM budget
    # (large H*W on v7x), add a spatial grid axis with a two-pass latent/visible
    # split instead of forcing the whole hw_pad slab into VMEM.
    cols_max = max(hw_pad, budget_bytes // per_col)
    bt_max = max(1, min(B, MAX_BT, cols_max // hw_pad))
    divisors = [d for d in range(1, B + 1) if B % d == 0 and d <= bt_max]
    if num_tc >= 2:
        # keep >= num_tc grid blocks when possible so all TensorCores get work.
        pref = [d for d in divisors if B // d >= num_tc]
        if pref:
            return max(pref)
    return max(divisors)


def _nchw_to_lane_major(x, hw_pad):
    B, C, H, W = x.shape
    hw = H * W
    xf = x.reshape(B, C, hw).astype(jnp.float32)
    if hw_pad != hw:
        xf = jnp.pad(xf, ((0, 0), (0, 0), (0, hw_pad - hw)))
    return jnp.transpose(xf, (1, 0, 2)).reshape(C, B * hw_pad)


def _lane_major_to_nchw(x_cb, B, C, H, W, hw_pad):
    hw = H * W
    xf = x_cb.reshape(C, B, hw_pad)[:, :, :hw]
    return jnp.transpose(xf, (1, 0, 2)).reshape(B, C, H, W)


def fau_layer(x_cb, fp, *, C, inter, lat, bt, hw_pad, hw_valid, vmem_limit_bytes):
    n_total = x_cb.shape[1]
    nt = bt * hw_pad
    grid = (n_total // nt,)

    def bcast(shape):
        return pl.BlockSpec(shape, lambda i: (0, 0))

    kernel = functools.partial(fau_layer_kernel, inter=inter, lat=lat, bt=bt,
                               hw_pad=hw_pad, hw_valid=hw_valid)

    return pl.pallas_call(
        kernel,
        out_shape=jax.ShapeDtypeStruct(x_cb.shape, jnp.float32),
        grid=grid,
        in_specs=[
            pl.BlockSpec((C, nt), lambda i: (0, i)),
            bcast(fp["wbig"].shape), bcast(fp["b1"].shape), bcast(fp["b2"].shape),
            bcast(fp["wup"].shape), bcast(fp["bup"].shape),
        ],
        out_specs=pl.BlockSpec((C, nt), lambda i: (0, i)),
        compiler_params=pltpu.CompilerParams(
            dimension_semantics=("parallel",),
            vmem_limit_bytes=vmem_limit_bytes),
    )(x_cb, fp["wbig"], fp["b1"], fp["b2"], fp["wup"], fp["bup"])


def faunet_forward(x_nchw, raw_layers, *, matmul_dtype=jnp.bfloat16):
    B, C, H, W = x_nchw.shape
    hw = H * W
    hw_pad = _round_up(hw, 128)               # lane-dense blocks / stores
    inter = raw_layers[0]["wq"].shape[0]
    lat = raw_layers[0]["wphi"].shape[0]

    num_tc, vmem_phys = _tpu_config()
    is_small_vmem = vmem_phys <= 64 * 2**20   # v7x
    budget = (20 * 2**20) if is_small_vmem else (48 * 2**20)
    cap = (48 * 2**20) if is_small_vmem else (100 * 2**20)

    per_col = _per_column_bytes(C, inter, lat)
    bt = _pick_batch_tile(B, hw_pad, per_col, budget, num_tc)
    est = per_col * bt * hw_pad
    vmem_limit = int(min(cap, max(32 * 2**20, 2 * est)))

    folded = [fold_layer_params(rp, matmul_dtype) for rp in raw_layers]
    x_cb = _nchw_to_lane_major(x_nchw, hw_pad)   # (C, B*hw_pad) f32

    # TODO(synk): for num_layer > 1, fuse the per-layer calls into a single
    # pallas_call (extra 'arbitrary' layer grid axis over stacked folded weights)
    # so x stays VMEM-resident instead of one HBM round trip per layer.
    for fp in folded:
        x_cb = fau_layer(x_cb, fp, C=C, inter=inter, lat=lat, bt=bt,
                         hw_pad=hw_pad, hw_valid=hw, vmem_limit_bytes=vmem_limit)

    return _lane_major_to_nchw(x_cb, B, C, H, W, hw_pad)


# ---------------------------------------------------------------------------
# Parameter construction / folding (deterministic)
# ---------------------------------------------------------------------------

def _bn_fold(gamma, beta, mean, var):
    scale = gamma / jnp.sqrt(var + EPS_BN)
    return scale, beta - mean * scale


def init_layer_params(key, in_channels, stride=4, latent_stride=2):
    inter = in_channels // stride
    lat = inter // latent_stride
    ks = jax.random.split(key, 10)

    def conv_w(k, o, i):
        return jax.random.normal(k, (o, i), jnp.float32) / jnp.sqrt(jnp.float32(i))

    def bn(k, c):
        k1, k2, k3, k4 = jax.random.split(k, 4)
        gamma = 1.0 + 0.1 * jax.random.normal(k1, (c,), jnp.float32)
        beta = 0.1 * jax.random.normal(k2, (c,), jnp.float32)
        mean = 0.1 * jax.random.normal(k3, (c,), jnp.float32)
        var = 1.0 + 0.1 * jax.random.uniform(k4, (c,), jnp.float32)
        return (gamma, beta, mean, var)

    return {
        "wq": conv_w(ks[0], inter, in_channels), "bn_q": bn(ks[1], inter),
        "wk": conv_w(ks[2], inter, in_channels), "bn_k": bn(ks[3], inter),
        "wphi": conv_w(ks[4], lat, inter), "bn_phi": bn(ks[5], lat),
        "wphip": conv_w(ks[6], lat, inter), "bn_phip": bn(ks[7], lat),
        "wup": conv_w(ks[8], in_channels, inter), "bn_up": bn(ks[9], in_channels),
        # torch inits lambda_ to zeros (layer == identity); use a nonzero value so
        # the whole graph path is exercised.
        "lam": jnp.float32(0.5),
    }


def fold_layer_params(rp, matmul_dtype=jnp.bfloat16):
    qs, qb = _bn_fold(*rp["bn_q"])
    ks_, kb = _bn_fold(*rp["bn_k"])
    ps, pb = _bn_fold(*rp["bn_phi"])
    pps, ppb = _bn_fold(*rp["bn_phip"])
    us, ub = _bn_fold(*rp["bn_up"])
    lam = rp["lam"]

    # BN-scale-folded q / k weights.
    wq_f = qs[:, None] * rp["wq"]               # (inter, C)
    wk_f = ks_[:, None] * rp["wk"]              # (inter, C)

    # phi / phi' composed with the (unnormalized) k / q paths:
    #   phi_k = ReLU( ((W_pk @ x) + c_pk) * (1/||k||) + pb )
    # where W_pk = (ps*wphi) @ (ks*wk) and c_pk = (ps*wphi) @ kb.
    wphi_s = ps[:, None] * rp["wphi"]           # (lat, inter)
    wphip_s = pps[:, None] * rp["wphip"]        # (lat, inter)
    w_pk = wphi_s @ wk_f                        # (lat, C)
    c_pk = wphi_s @ kb[:, None]                 # (lat, 1)
    w_pq = wphip_s @ wq_f                       # (lat, C)
    c_pq = wphip_s @ qb[:, None]                # (lat, 1)

    wbig = jnp.concatenate([wq_f, wk_f, w_pk, w_pq], axis=0)          # (2i+2l, C)
    b1 = jnp.concatenate([qb[:, None], kb[:, None], c_pk, c_pq], axis=0)
    b2 = jnp.concatenate([pb, ppb], axis=0)[:, None]                  # (2l, 1)

    # up_channel_conv with BN scale and lambda_ folded in.
    wup = (lam * us)[:, None] * rp["wup"]       # (C, inter)
    bup = (lam * ub)[:, None]                   # (C, 1)

    return {
        "wbig": wbig.astype(matmul_dtype), "b1": b1.astype(jnp.float32),
        "b2": b2.astype(jnp.float32),
        "wup": wup.astype(matmul_dtype), "bup": bup.astype(jnp.float32),
    }


# ---------------------------------------------------------------------------
# Pure-JAX f32 reference (original module semantics, eval-mode BN)
# ---------------------------------------------------------------------------

def reference_forward(x_nchw, raw_layers):
    B, C, H, W = x_nchw.shape
    xf = x_nchw.reshape(B, C, H * W).astype(jnp.float32)
    hi = lax.Precision.HIGHEST

    def norm(v, axis):
        n = jnp.sqrt(jnp.sum(v * v, axis=axis, keepdims=True))
        return v / jnp.maximum(n, EPS_NORM)

    for rp in raw_layers:
        qs, qb = _bn_fold(*rp["bn_q"]); ks_, kb = _bn_fold(*rp["bn_k"])
        ps, pb = _bn_fold(*rp["bn_phi"]); pps, ppb = _bn_fold(*rp["bn_phip"])
        us, ub = _bn_fold(*rp["bn_up"])

        q = jnp.einsum("oc,bcn->bon", rp["wq"], xf, precision=hi)
        q = q * qs[None, :, None] + qb[None, :, None]
        k = jnp.einsum("oc,bcn->bon", rp["wk"], xf, precision=hi)
        k = k * ks_[None, :, None] + kb[None, :, None]
        q = norm(q, 1)
        k = norm(k, 1)

        phi_k = jnp.maximum(jnp.einsum("lc,bcn->bln", rp["wphi"], k, precision=hi)
                            * ps[None, :, None] + pb[None, :, None], 0.0)
        adj_v2l = norm(phi_k, 2)
        latent = jnp.einsum("bln,bcn->blc", adj_v2l, k, precision=hi)
        ln = norm(latent, 2)
        aff = jax.nn.softmax(jnp.einsum("blc,bmc->blm", ln, ln, precision=hi), axis=-1)
        latent = jnp.einsum("blm,bmc->blc", aff, latent, precision=hi)

        phi_q = jnp.maximum(jnp.einsum("lc,bcn->bln", rp["wphip"], q, precision=hi)
                            * pps[None, :, None] + ppb[None, :, None], 0.0)
        adj_l2v = norm(phi_q, 1)
        visible = jnp.einsum("blc,bln->bcn", latent, adj_l2v, precision=hi)

        up = jnp.einsum("oc,bcn->bon", rp["wup"], visible, precision=hi)
        up = up * us[None, :, None] + ub[None, :, None]
        xf = xf + rp["lam"] * up
    return xf.reshape(B, C, H, W)


# ---------------------------------------------------------------------------

if __name__ == "__main__":
    # in_channels=32, stride=4 -> inter=8, latent_stride=2 -> latent=4,
    # num_layer=1, num_kernel=1 (module defaults).
    B, C, H, W = 2, 32, 16, 16
    x = jax.random.normal(jax.random.PRNGKey(0), (B, C, H, W), dtype=jnp.float32)
    raw_layers = [init_layer_params(jax.random.PRNGKey(1), C, stride=4, latent_stride=2)]

    y_ref = reference_forward(x, raw_layers)

    # f32-matmul run: tight check of the kernel structure / folding.
    y32 = jax.block_until_ready(faunet_forward(x, raw_layers, matmul_dtype=jnp.float32))
    assert y32.shape == (B, C, H, W)
    assert bool(jnp.all(jnp.isfinite(y32)))
    assert bool(jnp.allclose(y32, y_ref, rtol=2e-2, atol=2e-2)), (
        float(jnp.max(jnp.abs(y32 - y_ref))))

    # default bf16-MXU run (f32 accumulate / f32 normalizations): relaxed tolerance.
    y = jax.block_until_ready(faunet_forward(x, raw_layers))
    assert y.shape == (B, C, H, W)
    assert bool(jnp.all(jnp.isfinite(y)))
    assert bool(jnp.allclose(y, y_ref, rtol=5e-2, atol=5e-2)), (
        float(jnp.max(jnp.abs(y - y_ref))))

    print("KERNEL_OK")
</pallas_src>

<mosaic_0001>
module attributes {stable_mosaic.version = 11 : i64} {
  func.func @fau_layer_kernel(%arg0: i32, %arg1: memref<32x512xf32, #tpu.memory_space<vmem>>, %arg2: memref<24x32xf32, #tpu.memory_space<vmem>>, %arg3: memref<24x1xf32, #tpu.memory_space<vmem>>, %arg4: memref<8x1xf32, #tpu.memory_space<vmem>>, %arg5: memref<32x8xf32, #tpu.memory_space<vmem>>, %arg6: memref<32x1xf32, #tpu.memory_space<vmem>>, %arg7: memref<32x512xf32, #tpu.memory_space<vmem>>) attributes {dimension_semantics = [#tpu.dimension_semantics<parallel>], iteration_bounds = array<i64: 1>, scalar_prefetch = 0 : i64, scratch_operands = 0 : i64, tpu.core_type = #tpu.core_type<tc>, window_params = [{transform_indices = @transform_0, window_bounds = array<i64: 32, 512>}, {pipeline_mode = #tpu.pipeline_mode<synchronous>, transform_indices = @transform_1, window_bounds = array<i64: 24, 32>}, {pipeline_mode = #tpu.pipeline_mode<synchronous>, transform_indices = @transform_2, window_bounds = array<i64: 24, 1>}, {pipeline_mode = #tpu.pipeline_mode<synchronous>, transform_indices = @transform_3, window_bounds = array<i64: 8, 1>}, {pipeline_mode = #tpu.pipeline_mode<synchronous>, transform_indices = @transform_4, window_bounds = array<i64: 32, 8>}, {pipeline_mode = #tpu.pipeline_mode<synchronous>, transform_indices = @transform_5, window_bounds = array<i64: 32, 1>}, {transform_indices = @transform_6, window_bounds = array<i64: 32, 512>}]} {
    %c0 = arith.constant 0 : index
    %c0_0 = arith.constant 0 : index
    %0 = vector.load %arg1[%c0, %c0_0] : memref<32x512xf32, #tpu.memory_space<vmem>>, vector<32x512xf32>
    %c0_1 = arith.constant 0 : index
    %c0_2 = arith.constant 0 : index
    %1 = vector.load %arg2[%c0_1, %c0_2] : memref<24x32xf32, #tpu.memory_space<vmem>>, vector<24x32xf32>
    %cst = arith.constant dense<0.000000e+00> : vector<24x512xf32>
    %2 = tpu.matmul %1, %0, %cst {dimension_numbers = #tpu.dot_dimension_numbers<[1], [0], [0], [1], [0, 0, 1, 1], [], []>} : vector<24x32xf32>, vector<32x512xf32>, vector<24x512xf32> -> vector<24x512xf32>
    %c0_3 = arith.constant 0 : index
    %c0_4 = arith.constant 0 : index
    %3 = vector.load %arg3[%c0_3, %c0_4] : memref<24x1xf32, #tpu.memory_space<vmem>>, vector<24x1xf32>
    %4 = vector.broadcast %3 : vector<24x1xf32> to vector<24x512xf32>
    %5 = arith.addf %2, %4 : vector<24x512xf32>
    %6 = vector.extract_strided_slice %5 {offsets = [0, 0], sizes = [8, 512], strides = [1, 1]} : vector<24x512xf32> to vector<8x512xf32>
    %7 = vector.extract_strided_slice %5 {offsets = [8, 0], sizes = [8, 512], strides = [1, 1]} : vector<24x512xf32> to vector<8x512xf32>
    %8 = vector.extract_strided_slice %5 {offsets = [16, 0], sizes = [4, 512], strides = [1, 1]} : vector<24x512xf32> to vector<4x512xf32>
    %9 = vector.extract_strided_slice %5 {offsets = [20, 0], sizes = [4, 512], strides = [1, 1]} : vector<24x512xf32> to vector<4x512xf32>
    %10 = arith.mulf %6, %6 : vector<8x512xf32>
    %cst_5 = arith.constant dense<0.000000e+00> : vector<512xf32>
    %11 = vector.multi_reduction <add>, %10, %cst_5 [0] : vector<8x512xf32> to vector<512xf32>
    %12 = vector.shape_cast %11 : vector<512xf32> to vector<1x512xf32>
    %cst_6 = arith.constant 1.000000e-24 : f32
    %13 = vector.broadcast %cst_6 : f32 to vector<1x512xf32>
    %14 = arith.maximumf %12, %13 : vector<1x512xf32>
    %15 = math.rsqrt %14 : vector<1x512xf32>
    %16 = arith.mulf %7, %7 : vector<8x512xf32>
    %cst_7 = arith.constant dense<0.000000e+00> : vector<512xf32>
    %17 = vector.multi_reduction <add>, %16, %cst_7 [0] : vector<8x512xf32> to vector<512xf32>
    %18 = vector.shape_cast %17 : vector<512xf32> to vector<1x512xf32>
    %cst_8 = arith.constant 1.000000e-24 : f32
    %19 = vector.broadcast %cst_8 : f32 to vector<1x512xf32>
    %20 = arith.maximumf %18, %19 : vector<1x512xf32>
    %21 = math.rsqrt %20 : vector<1x512xf32>
    %22 = vector.broadcast %21 : vector<1x512xf32> to vector<8x512xf32>
    %23 = arith.mulf %7, %22 : vector<8x512xf32>
    %c0_9 = arith.constant 0 : index
    %c0_10 = arith.constant 0 : index
    %24 = vector.load %arg4[%c0_9, %c0_10] : memref<8x1xf32, #tpu.memory_space<vmem>>, vector<8x1xf32>
    %25 = vector.broadcast %21 : vector<1x512xf32> to vector<4x512xf32>
    %26 = arith.mulf %8, %25 : vector<4x512xf32>
    %27 = vector.extract_strided_slice %24 {offsets = [0, 0], sizes = [4, 1], strides = [1, 1]} : vector<8x1xf32> to vector<4x1xf32>
    %28 = vector.broadcast %27 : vector<4x1xf32> to vector<4x512xf32>
    %29 = arith.addf %26, %28 : vector<4x512xf32>
    %cst_11 = arith.constant 0.000000e+00 : f32
    %30 = vector.broadcast %cst_11 : f32 to vector<4x512xf32>
    %31 = arith.maximumf %29, %30 : vector<4x512xf32>
    %32 = vector.broadcast %15 : vector<1x512xf32> to vector<4x512xf32>
    %33 = arith.mulf %9, %32 : vector<4x512xf32>
    %34 = vector.extract_strided_slice %24 {offsets = [4, 0], sizes = [4, 1], strides = [1, 1]} : vector<8x1xf32> to vector<4x1xf32>
    %35 = vector.broadcast %34 : vector<4x1xf32> to vector<4x512xf32>
    %36 = arith.addf %33, %35 : vector<4x512xf32>
    %cst_12 = arith.constant 0.000000e+00 : f32
    %37 = vector.broadcast %cst_12 : f32 to vector<4x512xf32>
    %38 = arith.maximumf %36, %37 : vector<4x512xf32>
    %39 = arith.mulf %38, %38 : vector<4x512xf32>
    %cst_13 = arith.constant dense<0.000000e+00> : vector<512xf32>
    %40 = vector.multi_reduction <add>, %39, %cst_13 [0] : vector<4x512xf32> to vector<512xf32>
    %41 = vector.shape_cast %40 : vector<512xf32> to vector<1x512xf32>
    %cst_14 = arith.constant 1.000000e-24 : f32
    %42 = vector.broadcast %cst_14 : f32 to vector<1x512xf32>
    %43 = arith.maximumf %41, %42 : vector<1x512xf32>
    %44 = math.rsqrt %43 : vector<1x512xf32>
    %45 = vector.broadcast %44 : vector<1x512xf32> to vector<4x512xf32>
    %46 = arith.mulf %38, %45 : vector<4x512xf32>
    %c0_15 = arith.constant 0 : index
    %c0_16 = arith.constant 0 : index
    %47 = vector.load %arg5[%c0_15, %c0_16] : memref<32x8xf32, #tpu.memory_space<vmem>>, vector<32x8xf32>
    %c0_17 = arith.constant 0 : index
    %c0_18 = arith.constant 0 : index
    %48 = vector.load %arg6[%c0_17, %c0_18] : memref<32x1xf32, #tpu.memory_space<vmem>>, vector<32x1xf32>
    %49 = vector.extract_strided_slice %23 {offsets = [0, 0], sizes = [8, 256], strides = [1, 1]} : vector<8x512xf32> to vector<8x256xf32>
    %50 = vector.extract_strided_slice %31 {offsets = [0, 0], sizes = [4, 256], strides = [1, 1]} : vector<4x512xf32> to vector<4x256xf32>
    %51 = arith.mulf %50, %50 : vector<4x256xf32>
    %cst_19 = arith.constant dense<0.000000e+00> : vector<4xf32>
    %52 = vector.multi_reduction <add>, %51, %cst_19 [1] : vector<4x256xf32> to vector<4xf32>
    %53 = vector.shape_cast %52 : vector<4xf32> to vector<4x1xf32>
    %cst_20 = arith.constant 1.000000e-24 : f32
    %54 = vector.broadcast %cst_20 : f32 to vector<4x1xf32>
    %55 = arith.maximumf %53, %54 : vector<4x1xf32>
    %56 = math.rsqrt %55 : vector<4x1xf32>
    %57 = vector.broadcast %56 : vector<4x1xf32> to vector<4x256xf32>
    %58 = arith.mulf %50, %57 : vector<4x256xf32>
    %cst_21 = arith.constant dense<0.000000e+00> : vector<4x8xf32>
    %59 = tpu.matmul %58, %49, %cst_21 {dimension_numbers = #tpu.dot_dimension_numbers<[1], [1], [0], [0], [0, 0, 1, 0], [], []>} : vector<4x256xf32>, vector<8x256xf32>, vector<4x8xf32> -> vector<4x8xf32>
    %60 = arith.mulf %59, %59 : vector<4x8xf32>
    %cst_22 = arith.constant dense<0.000000e+00> : vector<4xf32>
    %61 = vector.multi_reduction <add>, %60, %cst_22 [1] : vector<4x8xf32> to vector<4xf32>
    %62 = vector.shape_cast %61 : vector<4xf32> to vector<4x1xf32>
    %cst_23 = arith.constant 1.000000e-24 : f32
    %63 = vector.broadcast %cst_23 : f32 to vector<4x1xf32>
    %64 = arith.maximumf %62, %63 : vector<4x1xf32>
    %65 = math.rsqrt %64 : vector<4x1xf32>
    %66 = vector.broadcast %65 : vector<4x1xf32> to vector<4x8xf32>
    %67 = arith.mulf %59, %66 : vector<4x8xf32>
    %cst_24 = arith.constant dense<0.000000e+00> : vector<4x4xf32>
    %68 = tpu.matmul %67, %67, %cst_24 {dimension_numbers = #tpu.dot_dimension_numbers<[1], [1], [0], [0], [0, 0, 1, 0], [], []>} : vector<4x8xf32>, vector<4x8xf32>, vector<4x4xf32> -> vector<4x4xf32>
    %69 = math.exp %68 : vector<4x4xf32>
    %cst_25 = arith.constant dense<0.000000e+00> : vector<4xf32>
    %70 = vector.multi_reduction <add>, %69, %cst_25 [1] : vector<4x4xf32> to vector<4xf32>
    %71 = vector.shape_cast %70 : vector<4xf32> to vector<4x1xf32>
    %72 = tpu.reciprocal %71 {approx = true} : vector<4x1xf32> -> vector<4x1xf32>
    %73 = vector.broadcast %72 : vector<4x1xf32> to vector<4x4xf32>
    %74 = arith.mulf %69, %73 : vector<4x4xf32>
    %cst_26 = arith.constant dense<0.000000e+00> : vector<4x8xf32>
    %75 = tpu.matmul %74, %59, %cst_26 {dimension_numbers = #tpu.dot_dimension_numbers<[1], [0], [0], [1], [0, 0, 1, 1], [], []>} : vector<4x4xf32>, vector<4x8xf32>, vector<4x8xf32> -> vector<4x8xf32>
    %cst_27 = arith.constant dense<0.000000e+00> : vector<32x4xf32>
    %76 = tpu.matmul %47, %75, %cst_27 {dimension_numbers = #tpu.dot_dimension_numbers<[1], [1], [0], [0], [0, 0, 1, 0], [], []>} : vector<32x8xf32>, vector<4x8xf32>, vector<32x4xf32> -> vector<32x4xf32>
    %77 = vector.extract_strided_slice %46 {offsets = [0, 0], sizes = [4, 256], strides = [1, 1]} : vector<4x512xf32> to vector<4x256xf32>
    %cst_28 = arith.constant dense<0.000000e+00> : vector<32x256xf32>
    %78 = tpu.matmul %76, %77, %cst_28 {dimension_numbers = #tpu.dot_dimension_numbers<[1], [0], [0], [1], [0, 0, 1, 1], [], []>} : vector<32x4xf32>, vector<4x256xf32>, vector<32x256xf32> -> vector<32x256xf32>
    %79 = vector.extract_strided_slice %0 {offsets = [0, 0], sizes = [32, 256], strides = [1, 1]} : vector<32x512xf32> to vector<32x256xf32>
    %80 = arith.addf %79, %78 : vector<32x256xf32>
    %81 = vector.broadcast %48 : vector<32x1xf32> to vector<32x256xf32>
    %82 = arith.addf %80, %81 : vector<32x256xf32>
    %c0_29 = arith.constant 0 : index
    %c0_30 = arith.constant 0 : index
    %83 = vector.load %arg7[%c0_29, %c0_30] : memref<32x512xf32, #tpu.memory_space<vmem>>, vector<32x256xf32>
    tpu.vector_store %arg7[%c0_29, %c0_30], %82 {strides = array<i32>} : memref<32x512xf32, #tpu.memory_space<vmem>>, vector<32x256xf32>,
    %84 = vector.extract_strided_slice %23 {offsets = [0, 256], sizes = [8, 256], strides = [1, 1]} : vector<8x512xf32> to vector<8x256xf32>
    %85 = vector.extract_strided_slice %31 {offsets = [0, 256], sizes = [4, 256], strides = [1, 1]} : vector<4x512xf32> to vector<4x256xf32>
    %86 = arith.mulf %85, %85 : vector<4x256xf32>
    %cst_31 = arith.constant dense<0.000000e+00> : vector<4xf32>
    %87 = vector.multi_reduction <add>, %86, %cst_31 [1] : vector<4x256xf32> to vector<4xf32>
    %88 = vector.shape_cast %87 : vector<4xf32> to vector<4x1xf32>
    %cst_32 = arith.constant 1.000000e-24 : f32
    %89 = vector.broadcast %cst_32 : f32 to vector<4x1xf32>
    %90 = arith.maximumf %88, %89 : vector<4x1xf32>
    %91 = math.rsqrt %90 : vector<4x1xf32>
    %92 = vector.broadcast %91 : vector<4x1xf32> to vector<4x256xf32>
    %93 = arith.mulf %85, %92 : vector<4x256xf32>
    %cst_33 = arith.constant dense<0.000000e+00> : vector<4x8xf32>
    %94 = tpu.matmul %93, %84, %cst_33 {dimension_numbers = #tpu.dot_dimension_numbers<[1], [1], [0], [0], [0, 0, 1, 0], [], []>} : vector<4x256xf32>, vector<8x256xf32>, vector<4x8xf32> -> vector<4x8xf32>
    %95 = arith.mulf %94, %94 : vector<4x8xf32>
    %cst_34 = arith.constant dense<0.000000e+00> : vector<4xf32>
    %96 = vector.multi_reduction <add>, %95, %cst_34 [1] : vector<4x8xf32> to vector<4xf32>
    %97 = vector.shape_cast %96 : vector<4xf32> to vector<4x1xf32>
    %cst_35 = arith.constant 1.000000e-24 : f32
    %98 = vector.broadcast %cst_35 : f32 to vector<4x1xf32>
    %99 = arith.maximumf %97, %98 : vector<4x1xf32>
    %100 = math.rsqrt %99 : vector<4x1xf32>
    %101 = vector.broadcast %100 : vector<4x1xf32> to vector<4x8xf32>
    %102 = arith.mulf %94, %101 : vector<4x8xf32>
    %cst_36 = arith.constant dense<0.000000e+00> : vector<4x4xf32>
    %103 = tpu.matmul %102, %102, %cst_36 {dimension_numbers = #tpu.dot_dimension_numbers<[1], [1], [0], [0], [0, 0, 1, 0], [], []>} : vector<4x8xf32>, vector<4x8xf32>, vector<4x4xf32> -> vector<4x4xf32>
    %104 = math.exp %103 : vector<4x4xf32>
    %cst_37 = arith.constant dense<0.000000e+00> : vector<4xf32>
    %105 = vector.multi_reduction <add>, %104, %cst_37 [1] : vector<4x4xf32> to vector<4xf32>
    %106 = vector.shape_cast %105 : vector<4xf32> to vector<4x1xf32>
    %107 = tpu.reciprocal %106 {approx = true} : vector<4x1xf32> -> vector<4x1xf32>
    %108 = vector.broadcast %107 : vector<4x1xf32> to vector<4x4xf32>
    %109 = arith.mulf %104, %108 : vector<4x4xf32>
    %cst_38 = arith.constant dense<0.000000e+00> : vector<4x8xf32>
    %110 = tpu.matmul %109, %94, %cst_38 {dimension_numbers = #tpu.dot_dimension_numbers<[1], [0], [0], [1], [0, 0, 1, 1], [], []>} : vector<4x4xf32>, vector<4x8xf32>, vector<4x8xf32> -> vector<4x8xf32>
    %cst_39 = arith.constant dense<0.000000e+00> : vector<32x4xf32>
    %111 = tpu.matmul %47, %110, %cst_39 {dimension_numbers = #tpu.dot_dimension_numbers<[1], [1], [0], [0], [0, 0, 1, 0], [], []>} : vector<32x8xf32>, vector<4x8xf32>, vector<32x4xf32> -> vector<32x4xf32>
    %112 = vector.extract_strided_slice %46 {offsets = [0, 256], sizes = [4, 256], strides = [1, 1]} : vector<4x512xf32> to vector<4x256xf32>
    %cst_40 = arith.constant dense<0.000000e+00> : vector<32x256xf32>
    %113 = tpu.matmul %111, %112, %cst_40 {dimension_numbers = #tpu.dot_dimension_numbers<[1], [0], [0], [1], [0, 0, 1, 1], [], []>} : vector<32x4xf32>, vector<4x256xf32>, vector<32x256xf32> -> vector<32x256xf32>
    %114 = vector.extract_strided_slice %0 {offsets = [0, 256], sizes = [32, 256], strides = [1, 1]} : vector<32x512xf32> to vector<32x256xf32>
    %115 = arith.addf %114, %113 : vector<32x256xf32>
    %116 = vector.broadcast %48 : vector<32x1xf32> to vector<32x256xf32>
    %117 = arith.addf %115, %116 : vector<32x256xf32>
    %c0_41 = arith.constant 0 : index
    %c256 = arith.constant 256 : index
    %118 = vector.load %arg7[%c0_41, %c256] : memref<32x512xf32, #tpu.memory_space<vmem>>, vector<32x256xf32>
    tpu.vector_store %arg7[%c0_41, %c256], %117 {strides = array<i32>} : memref<32x512xf32, #tpu.memory_space<vmem>>, vector<32x256xf32>,
    return
  }
  func.func @transform_0(%arg0: i32) -> (i32, i32) {
    %c0_i32 = arith.constant 0 : i32
    %c0_i32_0 = arith.constant 0 : i32
    return %c0_i32, %arg0 : i32, i32
  }
  func.func @transform_1(%arg0: i32) -> (i32, i32) {
    %c0_i32 = arith.constant 0 : i32
    %c0_i32_0 = arith.constant 0 : i32
    %c0_i32_1 = arith.constant 0 : i32
    return %c0_i32, %c0_i32_0 : i32, i32
  }
  func.func @transform_2(%arg0: i32) -> (i32, i32) {
    %c0_i32 = arith.constant 0 : i32
    %c0_i32_0 = arith.constant 0 : i32
    %c0_i32_1 = arith.constant 0 : i32
    return %c0_i32, %c0_i32_0 : i32, i32
  }
  func.func @transform_3(%arg0: i32) -> (i32, i32) {
    %c0_i32 = arith.constant 0 : i32
    %c0_i32_0 = arith.constant 0 : i32
    %c0_i32_1 = arith.constant 0 : i32
    return %c0_i32, %c0_i32_0 : i32, i32
  }
  func.func @transform_4(%arg0: i32) -> (i32, i32) {
    %c0_i32 = arith.constant 0 : i32
    %c0_i32_0 = arith.constant 0 : i32
    %c0_i32_1 = arith.constant 0 : i32
    return %c0_i32, %c0_i32_0 : i32, i32
  }
  func.func @transform_5(%arg0: i32) -> (i32, i32) {
    %c0_i32 = arith.constant 0 : i32
    %c0_i32_0 = arith.constant 0 : i32
    %c0_i32_1 = arith.constant 0 : i32
    return %c0_i32, %c0_i32_0 : i32, i32
  }
  func.func @transform_6(%arg0: i32) -> (i32, i32) {
    %c0_i32 = arith.constant 0 : i32
    %c0_i32_0 = arith.constant 0 : i32
    return %c0_i32, %arg0 : i32, i32
  }
}

</mosaic_0001>

<bundles_post_ra>
// kernel: tpu_custom_call.1
= control target key start
LH: loop header
LB: loop body
LE: loop exit
PB: predicated region body
PF: predicated region fallthrough
CT: control target
= control target key end

     0   :  { %11 = vsyncpa [#allocation3], 0  ;;  %s1965_s0 = inlined_call_operand.hbm [shape: f32[32,512], index: 0, kind: input, shape index: {}]   ;;  %s1966_s1 = inlined_call_operand.vmem [shape: f32[24,32], index: 1, kind: input, shape index: {}]   ;;  %s1967_s2 = inlined_call_operand.vmem [shape: f32[24,1], index: 2, kind: input, shape index: {}]   ;;  %s1968_s3 = inlined_call_operand.vmem [shape: f32[8,1], index: 3, kind: input, shape index: {}]   ;;  %s1969_s4 = inlined_call_operand.vmem [shape: f32[32,8], index: 4, kind: input, shape index: {}]   ;;  %s1970_s5 = inlined_call_operand.vmem [shape: f32[32,1], index: 5, kind: input, shape index: {}]   ;;  %s1971_s6 = inlined_call_operand.hbm [shape: f32[32,512], index: 6, kind: output, shape index: {}]  }
   0x1   :  { %12 = vsyncpa [#allocation4], 0  ;;  %s1612_s21 = smov [#allocation2]   ;;  %s1564_s25 = scalar_lea.hbm %s1965_s0, 2048 }
   0x2   :  { %s18_s22 = sshll.u32 %s1612_s21, 4  ;;  %p1565_p0 = scmp.ne.s32.totalorder %s1965_s0, %s1564_s25  ;;  %s19_s22 = int_to_ptr.vmem [resolvable:$true] %s18_s22 }
   0x3   :  { %p1568_p1 = scmp.lt.u32.totalorder %s1564_s25, %s1965_s0 }
   0x5   :  { %p1570_p2 = pnand %p1568_p1, %p1565_p0 }
   0x7   :  { %1573 = shalt.err (!%p1570_p2)
}
   0x8   :  { %s1574_s30 = scalar_lea.vmem %s19_s22, 2048  ;;  %p1579_p4 = scmp.lt.s32.totalorder %s19_s22, %s19_s22 }
   0x9   :  { %p1575_p3 = scmp.ne.s32.totalorder %s19_s22, %s1574_s30  ;;  %p1580_p5 = scmp.lt.s32.totalorder %s1574_s30, %s1574_s30 }
   0xb   :  { %p1581_p6 = por %p1580_p5, %p1579_p4 }
   0xd   :  { %p1582_p7 = pnand %p1581_p6, %p1575_p3 }
   0xf   :  { %1585 = shalt.err (!%p1582_p7)
}
  0x10   :  { %s1613_s7 = smov 512   ;;  %s1614_s8 = smov 32  }
  0x11   :  { %24 = dma.hbm_to_vmem [thread:$0]  %s1965_s0, 2048, %s19_s22, [#allocation3], %s1613_s7, %s1613_s7, %s1614_s8  }
  0x12   :  { %1608 = dma.done.wait [#allocation3], 2048  }
  0x13   :  { %1609 = vsyncadd [#allocation3], 4294965248  ;;  %v1615_v0 = vmov 0.0   ;;  %v1616_v1 = vmov 0   ;;  %v1671_v2 = vld [vmem:[#allocation2 + $0x8] sm:$0xff]  ;;  %v1675_v4 = vld [vmem:[#allocation2 + $0x18] sm:$0xff] }
  0x14   :  { %149 = vmatprep.mubr.f32.mxu0 %v1615_v0  ;;  %238 = vmatprep.mubr.f32.mxu1 %v1615_v0  ;;  %v1673_v3 = vld [vmem:[#allocation2 + $0x28] sm:$0xff]  ;;  %v1679_v6 = vld [vmem:[#allocation2 + $0x38] sm:$0xff]  ;;  %v1681_v7 = vld [vmem:[#allocation2] sm:$0xff]  ;;  %vm75_vm0 = vcmask 261120   ;;  %vm373_vm1 = vcmask 1043456   ;;  %vm504_vm2 = vcmask 60416  }
  0x15   :  { %1522 = vset.pattern.permute.xlu0 %v1616_v1  ;;  %1523 = vset.pattern.permute.xlu1 %v1616_v1  ;;  %v1495_v5 = vpack.c.bf16 %v1673_v3, %v1671_v2  ;;  %v1683_v8 = vld [vmem:[#allocation2 + $0x20] sm:$0xff]  ;;  %v1503_v9 = vpack.c.bf16 %v1679_v6, %v1675_v4  ;;  %v1689_v11 = vld [vmem:[#allocation2 + $0x10] sm:$0xff]  ;;  %v1693_v13 = vld [vmem:[#allocation2 + $0x48] sm:$0xff]  ;;  %vm1617_vm3 = vmmov 0   ;;  %vm511_vm4 = vcmask 64512  }
  0x16   :  { %v1497_v10 = vpack.c.bf16 %v1683_v8, %v1681_v7  ;;  %v1691_v12 = vld [vmem:[#allocation2 + $0x30] sm:$0xff]  ;;  %v1697_v15 = vld [vmem:[#allocation2 + $0x68] sm:$0xff]  ;;  %v1699_v16 = vld [vmem:[#allocation2 + $0x58] sm:$0xff]  ;;  %vm587_vm5 = vcmask 27648   ;;  %vm593_vm6 = vcmask 31744  }
  0x17   :  { %1496 = vmatprep.subr.bf16.mxu0 %v1495_v5  ;;  %v1505_v14 = vpack.c.bf16 %v1691_v12, %v1689_v11  ;;  %v1701_v17 = vld [vmem:[#allocation2 + $0x78] sm:$0xff]  ;;  %1511 = vmatprep.subr.bf16.mxu1 %v1503_v9  ;;  %v1499_v18 = vpack.c.bf16 %v1697_v15, %v1693_v13  ;;  %v1707_v20 = vld [vmem:[#allocation2 + $0x40] sm:$0xff]  ;;  %v1711_v22 = vld [vmem:[#allocation2 + $0x50] sm:$0xff] }
  0x18   :  { %1498 = vmatpush1.bf16.msra.mxu0 %v1497_v10  ;;  %v1507_v19 = vpack.c.bf16 %v1701_v17, %v1699_v16  ;;  %v1709_v21 = vld [vmem:[#allocation2 + $0x60] sm:$0xff]  ;;  %v1715_v24 = vld [vmem:[#allocation2 + $0x70] sm:$0xff]  ;;  %v58_v26 = vld [vmem:[%s1967_s2 + $0x8] sm:$0xff] }
  0x19   :  { %1513 = vmatpush1.bf16.msra.mxu1 %v1505_v14  ;;  %v1501_v23 = vpack.c.bf16 %v1709_v21, %v1707_v20  ;;  %1500 = vmatprep.subr.bf16.mxu0 %v1499_v18  ;;  %v1509_v25 = vpack.c.bf16 %v1715_v24, %v1711_v22  ;;  %v327_v27 = vld [vmem:[%s1968_s3] sm:$0xff]  ;;  %v59_v29 = vld [vmem:[%s1967_s2 + $0x10] sm:$0xff]  ;;  %v55_v30 = vld [vmem:[%s1966_s1 + $0x8] sm:$0xff] }
  0x1a   :  { %1512 = vmatprep.subr.bf16.mxu1 %v1507_v19  ;;  %67 = vperm.xlu0 %1522, %v58_v26   ;;  %v54_v28 = vld [vmem:[%s1966_s1] sm:$0xff]  ;;  %v56_v31 = vld [vmem:[%s1966_s1 + $0x10] sm:$0xff] }
  0x1b   :  { %334 = vperm.xlu1 %1523, %v327_v27  }
  0x1c   :  { %1502 = vmatpush1.bf16.msra.mxu0 %v1501_v23 }
  0x1d   :  { %1514 = vmatpush1.bf16.msra.mxu1 %v1509_v25  ;;  %1504 = vmatprep.subr.bf16.mxu0 %v1503_v9 }
  0x1e   :  { %1459 = vmatprep.subr.mxu1 %v1615_v0  ;;  %72 = vperm.xlu0 %1522, %v59_v29  }
  0x1f   :  { %1405 = vmatmul.mubr.msk.f32.vlgmr.msra.gmra.mrb[0].mxu0 %vm75_vm0, %v54_v28 }
  0x20   :  { %1409 = vmatmul.mubr.msk.f32.vlgmr.msra.gmra.mrb[0].mxu1 %vm75_vm0, %v55_v30  ;;  %155 = vmatprep.mubr.f32.mxu0 %v1615_v0 }
  0x21   :  { %244 = vmatprep.mubr.f32.mxu1 %v1615_v0  ;;  %1506 = vmatpush1.bf16.msra.mxu0 %v1505_v14 }
  0x22   :  { %1508 = vmatprep.subr.bf16.mxu0 %v1507_v19 }
  0x23   :  { %1406 = vmatmul.mubr.msk.f32.gmra.mrb[2].mxu0 %vm75_vm0, %v55_v30 }
  0x24   :  { %1410 = vmatmul.mubr.msk.f32.gmra.mrb[2].mxu1 %vm75_vm0, %v56_v31  ;;  %161 = vmatprep.mubr.f32.mxu0 %v1615_v0 }
  0x25   :  { %1510 = vmatpush1.bf16.msra.mxu0 %v1509_v25  ;;  %1461 = vmatprep.mubr.msk.f32.mxu1 %vm1617_vm3, %v1615_v0 }
  0x27   :  { %1407 = vmatmul.mubr.msk.f32.gmra.mrb[4].mxu0 %vm75_vm0, %v56_v31 }
  0x28   :  { %232 = vmatprep.mubr.f32.mxu0 %v1615_v0 }
  0x2b   :  { %1408 = vmatmul.mubr.msk.f32.vlgmr.msra.gmra.mrb[6].mxu0 %vm75_vm0, %v54_v28 }
  0x99   :  { %v68_v32 = vpop.permute.xlu0 %67 }
  0xf2   :  { %v1748_v33 = vpop.f32.mrb[0].mxu0 }
  0xf3   :  { %v240_v34 = vpop.f32.mrb[0].mxu1  ;;  %v1750_v35 = vpop.f32.mrb[1].mxu0 }
  0xf4   :  { %v241_v36 = vadd.f32 %v240_v34, %v68_v32  ;;  %v242_v37 = vpop.f32.mrb[1].mxu1 }
  0xf5   :  { %v243_v38 = vadd.f32 %v242_v37, %v68_v32 }
  0xf6   :  { %v289_v39 = vmul.f32 %v241_v36, %v241_v36  ;;  %v157_v40 = vpop.f32.mrb[2].mxu0 }
  0xf7   :  { %v290_v41 = vmul.f32 %v243_v38, %v243_v38  ;;  %v158_v42 = vadd.f32 %v157_v40, %v68_v32  ;;  %v246_v43 = vpop.f32.mrb[2].mxu1  ;;  %v159_v44 = vpop.f32.mrb[3].mxu0 }
  0xf8   :  { %v303_v45 = vrot.slane %v289_v39, 4  ;;  %v160_v46 = vadd.f32 %v159_v44, %v68_v32  ;;  %v248_v47 = vpop.f32.mrb[3].mxu1  ;;  %v73_v32 = vpop.permute.xlu0 %72 }
  0xf9   :  { %v309_v48 = vrot.slane %v290_v41, 4  ;;  %v287_v49 = vmul.f32 %v158_v42, %v158_v42  ;;  %v1752_v34 = vadd.f32 %v246_v43, %v73_v32  ;;  %v1756_v40 = vpop.permute.xlu1 %334 }
  0xfa   :  { %v304_v50 = vadd.f32 %v303_v45, %v289_v39  ;;  %v288_v51 = vmul.f32 %v160_v46, %v160_v46  ;;  %v163_v52 = vpop.f32.mrb[4].mxu0  ;;  %v1754_v39 = vadd.f32 %v248_v47, %v73_v32 }
  0xfb   :  { %v310_v53 = vadd.f32 %v309_v48, %v290_v41  ;;  %v291_v54 = vrot.slane %v287_v49, 4  ;;  %v165_v55 = vpop.f32.mrb[5].mxu0 }
  0xfc   :  { %v305_v56 = vrot.slane %v304_v50, 2  ;;  %v297_v57 = vrot.slane %v288_v51, 4 }
  0xfd   :  { %v311_v58 = vrot.slane %v310_v53, 2  ;;  %v292_v59 = vadd.f32 %v291_v54, %v287_v49 }
  0xfe   :  { %v306_v60 = vadd.f32 %v305_v56, %v304_v50  ;;  %v298_v61 = vadd.f32 %v297_v57, %v288_v51  ;;  %v1764_v50 = vadd.f32 %v163_v52, %v73_v32 }
  0xff   :  { %v312_v62 = vadd.f32 %v311_v58, %v310_v53  ;;  %v293_v63 = vrot.slane %v292_v59, 2  ;;  %v1766_v53 = vadd.f32 %v165_v55, %v73_v32 }
 0x100   :  { %v307_v1 = vrot.slane %v306_v60, 1  ;;  %v299_v5 = vrot.slane %v298_v61, 2 }
 0x101   :  { %v313_v9 = vrot.slane %v312_v62, 1  ;;  %v294_v10 = vadd.f32 %v293_v63, %v292_v59 }
 0x102   :  { %v308_v14 = vadd.f32 %v307_v1, %v306_v60  ;;  %v300_v18 = vadd.f32 %v299_v5, %v298_v61 }
 0x103   :  { %v314_v19 = vadd.f32 %v313_v9, %v312_v62  ;;  %v295_v23 = vrot.slane %v294_v10, 1 }
 0x104   :  { %v317_v25 = vmax.f32 %v308_v14, 1e-24  ;;  %v301_v26 = vrot.slane %v300_v18, 1 }
 0x105   :  { %v318_v27 = vmax.f32 %v314_v19, 1e-24  ;;  %v296_v28 = vadd.f32 %v295_v23, %v294_v10  ;;  %v1787_v19 = vpop.f32.mrb[6].mxu0 }
 0x106   :  { %1524 = vrsqrt.f32 %v317_v25  ;;  %v302_v29 = vadd.f32 %v301_v26, %v300_v18  ;;  %v1789_v23 = vpop.f32.mrb[7].mxu0 }
 0x107   :  { %1526 = vrsqrt.f32 %v318_v27  ;;  %v315_v30 = vmax.f32 %v296_v28, 1e-24 }
 0x108   :  { %v316_v31 = vmax.f32 %v302_v29, 1e-24 }
 0x109   :  { %1528 = vrsqrt.f32 %v315_v30 }
 0x10a   :  { %1530 = vrsqrt.f32 %v316_v31 }
 0x110   :  { %v1525_v37 = vpop.eup %1524 }
 0x111   :  { %v1527_v41 = vpop.eup %1526  ;;  %v1758_v44 = vmul.f32 %v1525_v37, %v241_v36  ;;  %v330_v45 = vmul.f32 %v1525_v37, %v1752_v34 }
 0x112   :  { %v1761_v48 = vmul.f32 %v1527_v41, %v243_v38  ;;  %v331_v49 = vmul.f32 %v1527_v41, %v1754_v39 }
 0x113   :  { %v1529_v51 = vpop.eup %1528  ;;  %v339_v43 = vadd.f32 %v1756_v40, %v330_v45 }
 0x114   :  { %v1531_v47 = vpop.eup %1530  ;;  %v328_v54 = vmul.f32 %v1529_v51, %v1764_v50  ;;  %v340_v56 = vadd.f32 %v1756_v40, %v331_v49  ;;  %v323_v58 = vmul.f32 %v1529_v51, %v158_v42 }
 0x115   :  { %v324_v36 = vmul.f32 %v1531_v47, %v160_v46  ;;  %v329_v57 = vmul.f32 %v1531_v47, %v1766_v53  ;;  %v1774_v59 = vmax.f32 %v339_v43, 0.0 }
 0x116   :  { %v337_v38 = vadd.f32 %v1756_v40, %v328_v54  ;;  %v1776_v55 = vmax.f32 %v340_v56, 0.0 }
 0x117   :  { %433 = vmatprep.subr.mxu0 %v324_v36  ;;  %v338_v52 = vadd.f32 %v1756_v40, %v329_v57  ;;  %v923_v42 = vmul.f32 %v1774_v59, %v1774_v59 }
 0x118   :  { %434 = vmatpush1.xpose.msra.mxu0 %v323_v58  ;;  %v341_v60 = vmax.f32 %v337_v38, 0.0  ;;  %v924_v63 = vmul.f32 %v1776_v55, %v1776_v55 }
 0x119   :  { %v342_v61 = vmax.f32 %v338_v52, 0.0  ;;  %1464 = vmatprep.subr.mxu0 %v1615_v0  ;;  %v925_v10 = vsel %vm373_vm1, %v923_v42, 0.0  ;;  %v1805_v52 = vld [vmem:[%s1969_s4] sm:$0xff]  ;;  %v1814_v42 = vld [vmem:[%s1969_s4 + $0x8] sm:$0xff] }
 0x11a   :  { %v422_v62 = vmul.f32 %v341_v60, %v341_v60  ;;  %v926_v14 = vsel %vm373_vm1, %v924_v63, 0.0  ;;  %v1820_v63 = vld [vmem:[%s1969_s4 + $0x10] sm:$0xff] }
 0x11b   :  { %v423_v46 = vmul.f32 %v342_v61, %v342_v61  ;;  %v927_v18 = vadd.f32 %v926_v14, %v925_v10 }
 0x11c   :  { %v424_v1 = vsel %vm373_vm1, %v422_v62, 0.0 }
 0x11d   :  { %v425_v5 = vsel %vm373_vm1, %v423_v46, 0.0 }
 0x11e   :  { %v426_v9 = vadd.f32 %v425_v5, %v424_v1  ;;  %v1830_v5 = vld [vmem:[%s1969_s4 + $0x18] sm:$0xff] }
 0x120   :  { %427 = vadd.xlane.f32.xlu1 %v426_v9 }
 0x124   :  { %928 = vadd.xlane.f32.xlu1 %v927_v18 }
 0x1ad   :  { %v428_v25 = vpop.xlane.xlu1 %427 }
 0x1ae   :  { %v429_v26 = vmax.f32 %v428_v25, 1e-24 }
 0x1b0   :  { %1532 = vrsqrt.f32 %v429_v26 }
 0x1ba   :  { %v1533_v27 = vpop.eup %1532 }
 0x1bb   :  { %v432_v28 = vmul.f32 %v1533_v27, %v342_v61  ;;  %v431_v29 = vmul.f32 %v1533_v27, %v341_v60  ;;  %v929_v60 = vpop.xlane.xlu1 %928 }
 0x1bc   :  { %v930_v61 = vmax.f32 %v929_v60, 1e-24 }
 0x1bd   :  { %497 = vmatprep.mubr.f32.mxu0 %v432_v28  ;;  %v420_v28 = vld [vmem:[%s1970_s5 + $0x10] sm:$0xff] }
 0x1be   :  { %498 = vmatmul.mubr.f32.vlgmr.msra.gmra.mrb[8].mxu0 %v431_v29 }
 0x1bf   :  { %1466 = vmatprep.mubr.msk.f32.mxu0 %vm1617_vm3, %v1615_v0 }
 0x291   :  { %v499_v30 = vpop.f32.mrb[8].mxu0 }
 0x292   :  { %v501_v31 = vpop.f32.mrb[9].mxu0  ;;  %1465 = vmatpush3.msk.msra.mxu0 %vm373_vm1, %v499_v30  ;;  %v503_v32 = vmul.f32 %v499_v30, %v499_v30 }
 0x294   :  { %v505_v37 = vsel %vm504_vm2, %v503_v32, 0.0 }
 0x295   :  { %506 = vadd.xlane.f32.xlu0 %v505_v37 }
 0x322   :  { %v507_v41 = vpop.xlane.xlu0 %506 }
 0x323   :  { %v508_v45 = vmax.f32 %v507_v41, 1e-24 }
 0x325   :  { %1534 = vrsqrt.f32 %v508_v45 }
 0x32f   :  { %v1535_v49 = vpop.eup %1534 }
 0x330   :  { %v510_v51 = vmul.f32 %v1535_v49, %v499_v30 }
 0x332   :  { %1460 = vmatpush3.xpose.msk.msra.mxu1 %vm511_vm4, %v510_v51 }
 0x335   :  { %1462 = vmatmul.mubr.msk.f32.vlgmr.msra.gmra.mrb[4].mxu1 %vm511_vm4, %v510_v51 }
 0x336   :  { %1471 = vmatprep.mubr.msk.f32.mxu1 %vm511_vm4, %v1805_v52 }
 0x408   :  { %v581_v43 = vpop.f32.mrb[4].mxu1 }
 0x409   :  { %v585_v47 = vmul.f32 1.442695, %v581_v43  ;;  %v1463_v54 = vpop.f32.mrb[5].mxu1 }
 0x40b   :  { %1536 = vpow2.f32 %v585_v47 }
 0x415   :  { %v1537_v56 = vpop.eup %1536 }
 0x416   :  { %v588_v36 = vsel %vm587_vm5, %v1537_v56, 0.0 }
 0x417   :  { %589 = vadd.xlane.f32.xlu0 %v588_v36 }
 0x4a4   :  { %v590_v57 = vpop.xlane.xlu0 %589 }
 0x4a5   :  { %1538 = vrcp.f32 %v590_v57 }
 0x4a6   :  { %1540 = vrsqrt.f32 %v930_v61 }
 0x4af   :  { %v1539_v58 = vpop.eup %1538 }
 0x4b0   :  { %v592_v38 = vmul.f32 %v1539_v58, %v1537_v56  ;;  %v1541_v1 = vpop.eup %1540 }
 0x4b1   :  { %v932_v9 = vmul.f32 %v1541_v1, %v1774_v59  ;;  %v57_v59 = vld [vmem:[%s1967_s2] sm:$0xff] }
 0x4b2   :  { %1467 = vmatmul.mubr.msk.f32.vlgmr.msra.gmra.mrb[10].mxu0 %vm593_vm6, %v592_v38 }
 0x4b3   :  { %854 = vmatprep.mubr.f32.mxu0 %v1615_v0 }
 0x585   :  { %v666_v62 = vpop.f32.mrb[10].mxu0 }
 0x586   :  { %v1468_v46 = vpop.f32.mrb[11].mxu0  ;;  %1469 = vmatprep.subr.msk.mxu1 %vm511_vm4, %v666_v62 }
 0x587   :  { %1470 = vmatpush3.xpose.msk.msra.mxu1 %vm511_vm4, %v666_v62 }
 0x588   :  { %934 = vmatprep.subr.mxu1 %v1761_v48  ;;  %v933_v48 = vmul.f32 %v1541_v1, %v1776_v55 }
 0x58a   :  { %1472 = vmatmul.mubr.msk.f32.vlgmr.msra.gmra.mrb[6].mxu1 %vm511_vm4, %v1814_v42 }
 0x58b   :  { %935 = vmatpush1.xpose.msra.mxu1 %v1758_v44  ;;  %1474 = vmatprep.mubr.msk.f32.mxu1 %vm511_vm4, %v1820_v63 }
 0x58c   :  { %1477 = vmatprep.subr.mxu1 %v1615_v0 }
 0x58e   :  { %1475 = vmatmul.mubr.msk.f32.gmra.mrb[8].mxu1 %vm511_vm4, %v1830_v5 }
 0x58f   :  { %998 = vmatprep.mubr.f32.mxu1 %v933_v48 }
 0x592   :  { %999 = vmatmul.mubr.f32.vlgmr.msra.gmra.mrb[10].mxu1 %v932_v9 }
 0x593   :  { %1479 = vmatprep.mubr.msk.f32.mxu1 %vm1617_vm3, %v1615_v0 }
 0x65d   :  { %v1839_v44 = vpop.f32.mrb[6].mxu1 }
 0x65e   :  { %v1841_v10 = vpop.f32.mrb[7].mxu1 }
 0x661   :  { %v1843_v14 = vpop.f32.mrb[8].mxu1 }
 0x662   :  { %v1845_v18 = vpop.f32.mrb[9].mxu1 }
 0x665   :  { %v1000_v25 = vpop.f32.mrb[10].mxu1 }
 0x666   :  { %v1002_v55 = vpop.f32.mrb[11].mxu1  ;;  %v1004_v26 = vmul.f32 %v1000_v25, %v1000_v25 }
 0x668   :  { %v1005_v27 = vsel %vm504_vm2, %v1004_v26, 0.0 }
 0x669   :  { %1006 = vadd.xlane.f32.xlu0 %v1005_v27 }
 0x67f   :  { %62 = vperm.xlu0 %1522, %v57_v59  }
 0x683   :  { %899 = vperm.xlu0 %1522, %v420_v28  }
 0x6f6   :  { %v1007_v29 = vpop.xlane.xlu0 %1006 }
 0x6f7   :  { %v1008_v30 = vmax.f32 %v1007_v29, 1e-24 }
 0x6f9   :  { %1542 = vrsqrt.f32 %v1008_v30 }
 0x6fe   :  { %v63_v31 = vpop.permute.xlu0 %62 }
 0x6ff   :  { %v152_v32 = vadd.f32 %v1748_v33, %v63_v31  ;;  %v154_v37 = vadd.f32 %v1750_v35, %v63_v31  ;;  %v1857_v41 = vadd.f32 %v1787_v19, %v63_v31  ;;  %v237_v45 = vadd.f32 %v1789_v23, %v63_v31 }
 0x701   :  { %v251_v49 = vmul.f32 %v152_v32, %v152_v32  ;;  %v252_v51 = vmul.f32 %v154_v37, %v154_v37  ;;  %v254_v43 = vmul.f32 %v237_v45, %v237_v45 }
 0x703   :  { %v1543_v47 = vpop.eup %1542  ;;  %v255_v54 = vrot.slane %v251_v49, 4  ;;  %v261_v56 = vrot.slane %v252_v51, 4  ;;  %v273_v36 = vrot.slane %v254_v43, 4 }
 0x704   :  { %v1010_v57 = vmul.f32 %v1543_v47, %v1000_v25 }
 0x705   :  { %v256_v58 = vadd.f32 %v255_v54, %v251_v49  ;;  %v262_v38 = vadd.f32 %v261_v56, %v252_v51  ;;  %v274_v60 = vadd.f32 %v273_v36, %v254_v43 }
 0x706   :  { %1478 = vmatpush3.xpose.msk.msra.mxu1 %vm511_vm4, %v1010_v57 }
 0x707   :  { %v257_v33 = vrot.slane %v256_v58, 2  ;;  %v263_v35 = vrot.slane %v262_v38, 2  ;;  %v275_v61 = vrot.slane %v274_v60, 2  ;;  %1482 = vmatprep.subr.mxu1 %v1615_v0 }
 0x709   :  { %v258_v19 = vadd.f32 %v257_v33, %v256_v58  ;;  %v264_v23 = vadd.f32 %v263_v35, %v262_v38  ;;  %v276_v62 = vadd.f32 %v275_v61, %v274_v60  ;;  %1480 = vmatmul.mubr.msk.f32.vlgmr.msra.gmra.mrb[12].mxu1 %vm511_vm4, %v1010_v57 }
 0x70a   :  { %1483 = vmatpush3.msk.msra.mxu1 %vm373_vm1, %v1000_v25  ;;  %1484 = vmatprep.mubr.msk.f32.mxu1 %vm1617_vm3, %v1615_v0 }
 0x70b   :  { %v259_v46 = vrot.slane %v258_v19, 1  ;;  %v265_v1 = vrot.slane %v264_v23, 1  ;;  %v277_v48 = vrot.slane %v276_v62, 1 }
 0x70d   :  { %v260_v9 = vadd.f32 %v259_v46, %v258_v19  ;;  %v266_v55 = vadd.f32 %v265_v1, %v264_v23  ;;  %v278_v26 = vadd.f32 %v277_v48, %v276_v62 }
 0x70f   :  { %v279_v27 = vmax.f32 %v260_v9, 1e-24  ;;  %v280_v59 = vmax.f32 %v266_v55, 1e-24  ;;  %v282_v28 = vmax.f32 %v278_v26, 1e-24 }
 0x711   :  { %1544 = vrsqrt.f32 %v279_v27 }
 0x712   :  { %1546 = vrsqrt.f32 %v280_v59 }
 0x713   :  { %1548 = vrsqrt.f32 %v282_v28 }
 0x71b   :  { %v1545_v29 = vpop.eup %1544 }
 0x71c   :  { %v1547_v30 = vpop.eup %1546  ;;  %v345_v31 = vmul.f32 %v1545_v29, %v1764_v50 }
 0x71d   :  { %v346_v25 = vmul.f32 %v1547_v30, %v1766_v53  ;;  %v1549_v32 = vpop.eup %1548 }
 0x71e   :  { %v349_v37 = vadd.f32 %v345_v31, %v1756_v40  ;;  %v348_v49 = vmul.f32 %v1549_v32, %v1754_v39 }
 0x71f   :  { %v350_v45 = vadd.f32 %v346_v25, %v1756_v40 }
 0x720   :  { %v353_v51 = vmax.f32 %v349_v37, 0.0  ;;  %v352_v47 = vadd.f32 %v348_v49, %v1756_v40 }
 0x721   :  { %v354_v43 = vmax.f32 %v350_v45, 0.0 }
 0x722   :  { %v357_v54 = vmul.f32 %v353_v51, %v353_v51  ;;  %v356_v36 = vmax.f32 %v352_v47, 0.0 }
 0x723   :  { %v358_v56 = vmul.f32 %v354_v43, %v354_v43 }
 0x724   :  { %v365_v57 = vrot.slane %v357_v54, 4  ;;  %v360_v38 = vmul.f32 %v356_v36, %v356_v36 }
 0x725   :  { %v366_v58 = vrot.slane %v358_v56, 4 }
 0x726   :  { %v374_v50 = vsel %vm373_vm1, %v365_v57, 0.0  ;;  %v368_v60 = vrot.slane %v360_v38, 4 }
 0x727   :  { %v381_v53 = vsel %vm373_vm1, %v366_v58, 0.0  ;;  %v375_v33 = vrot.slane %v374_v50, 4 }
 0x728   :  { %v382_v35 = vrot.slane %v381_v53, 4  ;;  %v395_v61 = vsel %vm373_vm1, %v368_v60, 0.0 }
 0x729   :  { %v376_v39 = vadd.f32 %v375_v33, %v374_v50  ;;  %v396_v23 = vrot.slane %v395_v61, 4 }
 0x72a   :  { %v383_v19 = vadd.f32 %v382_v35, %v381_v53  ;;  %v253_v53 = vmul.f32 %v1857_v41, %v1857_v41 }
 0x72b   :  { %v377_v62 = vrot.slane %v376_v39, 2  ;;  %v397_v1 = vadd.f32 %v396_v23, %v395_v61 }
 0x72c   :  { %v384_v46 = vrot.slane %v383_v19, 2  ;;  %v267_v60 = vrot.slane %v253_v53, 4 }
 0x72d   :  { %v378_v48 = vadd.f32 %v377_v62, %v376_v39  ;;  %v398_v55 = vrot.slane %v397_v1, 2 }
 0x72e   :  { %v385_v9 = vadd.f32 %v384_v46, %v383_v19  ;;  %v268_v61 = vadd.f32 %v267_v60, %v253_v53 }
 0x72f   :  { %v379_v26 = vrot.slane %v378_v48, 1  ;;  %v399_v59 = vadd.f32 %v398_v55, %v397_v1 }
 0x730   :  { %v386_v27 = vrot.slane %v385_v9, 1  ;;  %v269_v23 = vrot.slane %v268_v61, 2 }
 0x731   :  { %v380_v28 = vadd.f32 %v379_v26, %v378_v48  ;;  %v400_v30 = vrot.slane %v399_v59, 1 }
 0x732   :  { %v387_v29 = vadd.f32 %v386_v27, %v385_v9  ;;  %v270_v48 = vadd.f32 %v269_v23, %v268_v61  ;;  %v1907_v9 = vpop.permute.xlu0 %899 }
 0x733   :  { %v402_v31 = vmax.f32 %v380_v28, 1e-24  ;;  %v401_v32 = vadd.f32 %v400_v30, %v399_v59 }
 0x734   :  { %v403_v25 = vmax.f32 %v387_v29, 1e-24  ;;  %v271_v28 = vrot.slane %v270_v48, 1 }
 0x735   :  { %1550 = vrsqrt.f32 %v402_v31  ;;  %v405_v37 = vmax.f32 %v401_v32, 1e-24 }
 0x736   :  { %1552 = vrsqrt.f32 %v403_v25  ;;  %v272_v29 = vadd.f32 %v271_v28, %v270_v48 }
 0x737   :  { %1554 = vrsqrt.f32 %v405_v37 }
 0x738   :  { %v281_v30 = vmax.f32 %v272_v29, 1e-24 }
 0x73f   :  { %v1551_v45 = vpop.eup %1550 }
 0x740   :  { %v1553_v49 = vpop.eup %1552  ;;  %v410_v47 = vmul.f32 %v1551_v45, %v353_v51 }
 0x741   :  { %v411_v54 = vmul.f32 %v1553_v49, %v354_v43  ;;  %v1555_v56 = vpop.eup %1554 }
 0x742   :  { %v772_v57 = vrot.slane %v410_v47, 4  ;;  %v413_v38 = vmul.f32 %v1555_v56, %v356_v36 }
 0x743   :  { %v773_v58 = vrot.slane %v411_v54, 4 }
 0x744   :  { %v1258_v50 = vrot.slane %v413_v38, 4 }
 0x745   :  { %1420 = vmatprep.subr.msk.mxu0 %vm373_vm1, %v773_v58 }
 0x746   :  { %1421 = vmatpush1.msk.msra.mxu0 %vm373_vm1, %v772_v57  ;;  %1435 = vmatprep.subr.msk.mxu1 %vm373_vm1, %v1258_v50 }
 0x747   :  { %1422 = vmatmul.mubr.msk.f32.vlgmr.msra.gmra.mrb[12].mxu0 %vm593_vm6, %v1841_v10 }
 0x748   :  { %860 = vmatprep.mubr.f32.mxu0 %v1615_v0 }
 0x74b   :  { %1423 = vmatmul.mubr.msk.f32.gmra.mrb[14].mxu0 %vm593_vm6, %v1839_v44 }
 0x74c   :  { %866 = vmatprep.mubr.f32.mxu0 %v1615_v0 }
 0x74f   :  { %1424 = vmatmul.mubr.msk.f32.gmra.mrb[16].mxu0 %vm593_vm6, %v1845_v18  ;;  %v418_v18 = vld [vmem:[%s1970_s5] sm:$0xff] }
 0x750   :  { %872 = vmatprep.mubr.f32.mxu0 %v1615_v0 }
 0x753   :  { %1425 = vmatmul.mubr.msk.f32.gmra.mrb[18].mxu0 %vm593_vm6, %v1843_v14  ;;  %v419_v14 = vld [vmem:[%s1970_s5 + $0x8] sm:$0xff] }
 0x754   :  { %1489 = vmatprep.mubr.msk.f32.mxu0 %vm511_vm4, %v1805_v52  ;;  %v421_v52 = vld [vmem:[%s1970_s5 + $0x18] sm:$0xff]  ;;  %s1618_s5 = smov [#allocation5]  }
 0x755   :  { %s1393_s13 = sshll.u32 %s1618_s5, 4  ;;  %s1394_s13 = int_to_ptr.vmem [resolvable:$true] %s1393_s13 }
 0x756   :  { %s1586_s14 = scalar_lea.vmem %s1394_s13, 2048  ;;  %p1591_p9 = scmp.lt.s32.totalorder %s1394_s13, %s1394_s13 }
 0x757   :  { %p1587_p8 = scmp.ne.s32.totalorder %s1394_s13, %s1586_s14  ;;  %p1592_p10 = scmp.lt.s32.totalorder %s1586_s14, %s1586_s14 }
 0x759   :  { %p1593_p11 = por %p1592_p10, %p1591_p9 }
 0x75b   :  { %p1594_p12 = pnand %p1593_p11, %p1587_p8 }
 0x7dc   :  { %v1080_v51 = vpop.f32.mrb[12].mxu1 }
 0x7dd   :  { %v1084_v10 = vmul.f32 1.442695, %v1080_v51  ;;  %v1481_v43 = vpop.f32.mrb[13].mxu1 }
 0x7df   :  { %1556 = vpow2.f32 %v1084_v10 }
 0x7e0   :  { %1558 = vrsqrt.f32 %v281_v30 }
 0x7e9   :  { %v1891_v36 = vpop.eup %1556 }
 0x7ea   :  { %v1086_v44 = vsel %vm587_vm5, %v1891_v36, 0.0  ;;  %v1559_v31 = vpop.eup %1558 }
 0x7eb   :  { %1087 = vadd.xlane.f32.xlu1 %v1086_v44 }
 0x7fc   :  { %889 = vperm.xlu1 %1523, %v418_v18  }
 0x800   :  { %894 = vperm.xlu1 %1523, %v419_v14  }
 0x804   :  { %904 = vperm.xlu1 %1523, %v421_v52  }
 0x81a   :  { %v856_v33 = vpop.f32.mrb[12].mxu0 }
 0x81b   :  { %v858_v35 = vpop.f32.mrb[13].mxu0  ;;  %v879_v51 = vadd.f32 %v856_v33, %v1681_v7 }
 0x81e   :  { %v862_v39 = vpop.f32.mrb[14].mxu0 }
 0x81f   :  { %v864_v19 = vpop.f32.mrb[15].mxu0  ;;  %v881_v18 = vadd.f32 %v862_v39, %v1683_v8 }
 0x820   :  { %v882_v14 = vadd.f32 %v864_v19, %v1673_v3 }
 0x822   :  { %v868_v62 = vpop.f32.mrb[16].mxu0 }
 0x823   :  { %v883_v46 = vadd.f32 %v868_v62, %v1707_v20  ;;  %v870_v1 = vpop.f32.mrb[17].mxu0  ;;  %v347_v20 = vmul.f32 %v1559_v31, %v1752_v34  ;;  %v880_v34 = vadd.f32 %v858_v35, %v1671_v2 }
 0x824   :  { %v884_v55 = vadd.f32 %v870_v1, %v1693_v13 }
 0x825   :  { %v911_v26 = vadd.f32 %v1907_v9, %v883_v46  ;;  %v351_v25 = vadd.f32 %v347_v20, %v1756_v40 }
 0x826   :  { %v912_v41 = vadd.f32 %v1907_v9, %v884_v55  ;;  %v874_v27 = vpop.f32.mrb[18].mxu0 }
 0x827   :  { %919 = vst [vmem:[#allocation5 + $0x40] sm:$0xff] %v911_v26  ;;  %v876_v59 = vpop.f32.mrb[19].mxu0  ;;  %v355_v32 = vmax.f32 %v351_v25, 0.0  ;;  %v885_v62 = vadd.f32 %v874_v27, %v1709_v21 }
 0x828   :  { %920 = vst [vmem:[#allocation5 + $0x48] sm:$0xff] %v912_v41  ;;  %v886_v7 = vadd.f32 %v876_v59, %v1697_v15 }
 0x829   :  { %v359_v37 = vmul.f32 %v355_v32, %v355_v32 }
 0x82b   :  { %v367_v13 = vrot.slane %v359_v37, 4 }
 0x82d   :  { %v388_v45 = vsel %vm373_vm1, %v367_v13, 0.0 }
 0x82e   :  { %v389_v49 = vrot.slane %v388_v45, 4 }
 0x830   :  { %v390_v47 = vadd.f32 %v389_v49, %v388_v45 }
 0x832   :  { %v391_v54 = vrot.slane %v390_v47, 2 }
 0x834   :  { %v392_v56 = vadd.f32 %v391_v54, %v390_v47 }
 0x836   :  { %v393_v57 = vrot.slane %v392_v56, 1 }
 0x838   :  { %v394_v58 = vadd.f32 %v393_v57, %v392_v56 }
 0x83a   :  { %v404_v38 = vmax.f32 %v394_v58, 1e-24 }
 0x83c   :  { %1560 = vrsqrt.f32 %v404_v38 }
 0x846   :  { %v1561_v44 = vpop.eup %1560 }
 0x847   :  { %v412_v61 = vmul.f32 %v1561_v44, %v355_v32 }
 0x849   :  { %v1257_v39 = vrot.slane %v412_v61, 4 }
 0x878   :  { %v1088_v50 = vpop.xlane.xlu1 %1087 }
 0x879   :  { %1562 = vrcp.f32 %v1088_v50 }
 0x87c   :  { %v890_v40 = vpop.permute.xlu1 %889 }
 0x87d   :  { %v907_v10 = vadd.f32 %v890_v40, %v879_v51  ;;  %v908_v43 = vadd.f32 %v890_v40, %v880_v34 }
 0x87f   :  { %915 = vst [vmem:[#allocation5] sm:$0xff] %v907_v10  ;;  %916 = vst [vmem:[#allocation5 + $0x8] sm:$0xff] %v908_v43 }
 0x880   :  { %v895_v52 = vpop.permute.xlu1 %894 }
 0x881   :  { %v909_v53 = vadd.f32 %v895_v52, %v881_v18  ;;  %v910_v60 = vadd.f32 %v895_v52, %v882_v14 }
 0x883   :  { %v1563_v23 = vpop.eup %1562  ;;  %917 = vst [vmem:[#allocation5 + $0x20] sm:$0xff] %v909_v53  ;;  %918 = vst [vmem:[#allocation5 + $0x28] sm:$0xff] %v910_v60 }
 0x884   :  { %v1090_v2 = vmul.f32 %v1563_v23, %v1891_v36  ;;  %v905_v33 = vpop.permute.xlu1 %904 }
 0x885   :  { %v913_v35 = vadd.f32 %v905_v33, %v885_v62  ;;  %v914_v8 = vadd.f32 %v905_v33, %v886_v7 }
 0x886   :  { %1485 = vmatmul.mubr.msk.f32.vlgmr.msra.gmra.mrb[14].mxu1 %vm593_vm6, %v1090_v2 }
 0x887   :  { %921 = vst [vmem:[#allocation5 + $0x60] sm:$0xff] %v913_v35  ;;  %922 = vst [vmem:[#allocation5 + $0x68] sm:$0xff] %v914_v8  ;;  %1436 = vmatpush1.msk.msra.mxu1 %vm373_vm1, %v1257_v39  ;;  %1339 = vmatprep.mubr.f32.mxu1 %v1615_v0 }
 0x959   :  { %v1163_v3 = vpop.f32.mrb[14].mxu1 }
 0x95a   :  { %v1486_v21 = vpop.f32.mrb[15].mxu1  ;;  %1487 = vmatprep.subr.msk.mxu0 %vm511_vm4, %v1163_v3 }
 0x95b   :  { %1488 = vmatpush3.xpose.msk.msra.mxu0 %vm511_vm4, %v1163_v3 }
 0x95e   :  { %1490 = vmatmul.mubr.msk.f32.vlgmr.msra.gmra.mrb[20].mxu0 %vm511_vm4, %v1814_v42 }
 0x95f   :  { %1492 = vmatprep.mubr.msk.f32.mxu0 %vm511_vm4, %v1820_v63 }
 0x962   :  { %1493 = vmatmul.mubr.msk.f32.gmra.mrb[22].mxu0 %vm511_vm4, %v1830_v5 }
 0xa31   :  { %v1491_v15 = vpop.f32.mrb[20].mxu0 }
 0xa32   :  { %v1236_v36 = vpop.f32.mrb[21].mxu0 }
 0xa33   :  { %1437 = vmatmul.mubr.msk.f32.vlgmr.msra.gmra.mrb[16].mxu1 %vm593_vm6, %v1236_v36 }
 0xa34   :  { %1345 = vmatprep.mubr.f32.mxu1 %v1615_v0 }
 0xa35   :  { %v1494_v19 = vpop.f32.mrb[22].mxu0 }
 0xa36   :  { %v1246_v46 = vpop.f32.mrb[23].mxu0 }
 0xa37   :  { %1438 = vmatmul.mubr.msk.f32.gmra.mrb[18].mxu1 %vm593_vm6, %v1491_v15 }
 0xa38   :  { %1351 = vmatprep.mubr.f32.mxu1 %v1615_v0 }
 0xa3b   :  { %1439 = vmatmul.mubr.msk.f32.gmra.mrb[20].mxu1 %vm593_vm6, %v1246_v46 }
 0xa3c   :  { %1357 = vmatprep.mubr.f32.mxu1 %v1615_v0 }
 0xa3f   :  { %1440 = vmatmul.mubr.msk.f32.gmra.mrb[22].mxu1 %vm593_vm6, %v1494_v19 }
 0xb06   :  { %v1341_v42 = vpop.f32.mrb[16].mxu1 }
 0xb07   :  { %v1364_v63 = vadd.f32 %v1341_v42, %v1689_v11  ;;  %v1343_v5 = vpop.f32.mrb[17].mxu1 }
 0xb08   :  { %v1365_v1 = vadd.f32 %v1343_v5, %v1675_v4 }
 0xb09   :  { %v1372_v48 = vadd.f32 %v1364_v63, %v890_v40 }
 0xb0a   :  { %v1373_v55 = vadd.f32 %v1365_v1, %v890_v40  ;;  %v1347_v26 = vpop.f32.mrb[18].mxu1 }
 0xb0b   :  { %1380 = vst [vmem:[#allocation5 + $0x10] sm:$0xff] %v1372_v48  ;;  %v1366_v41 = vadd.f32 %v1347_v26, %v1691_v12  ;;  %v1349_v27 = vpop.f32.mrb[19].mxu1 }
 0xb0c   :  { %1381 = vst [vmem:[#allocation5 + $0x18] sm:$0xff] %v1373_v55  ;;  %v1367_v59 = vadd.f32 %v1349_v27, %v1679_v6 }
 0xb0d   :  { %v1374_v28 = vadd.f32 %v1366_v41, %v895_v52 }
 0xb0e   :  { %v1375_v0 = vadd.f32 %v1367_v59, %v895_v52  ;;  %v1353_v29 = vpop.f32.mrb[20].mxu1 }
 0xb0f   :  { %1382 = vst [vmem:[#allocation5 + $0x30] sm:$0xff] %v1374_v28  ;;  %v1368_v30 = vadd.f32 %v1353_v29, %v1711_v22  ;;  %v1355_v11 = vpop.f32.mrb[21].mxu1 }
 0xb10   :  { %1383 = vst [vmem:[#allocation5 + $0x38] sm:$0xff] %v1375_v0  ;;  %v1369_v4 = vadd.f32 %v1355_v11, %v1699_v16 }
 0xb11   :  { %v1376_v31 = vadd.f32 %v1368_v30, %v1907_v9 }
 0xb12   :  { %v1377_v20 = vadd.f32 %v1369_v4, %v1907_v9  ;;  %v1359_v25 = vpop.f32.mrb[22].mxu1 }
 0xb13   :  { %1384 = vst [vmem:[#allocation5 + $0x50] sm:$0xff] %v1376_v31  ;;  %v1370_v12 = vadd.f32 %v1359_v25, %v1715_v24  ;;  %v1361_v32 = vpop.f32.mrb[23].mxu1 }
 0xb14   :  { %1385 = vst [vmem:[#allocation5 + $0x58] sm:$0xff] %v1377_v20  ;;  %v1371_v6 = vadd.f32 %v1361_v32, %v1701_v17 }
 0xb15   :  { %v1378_v37 = vadd.f32 %v1370_v12, %v905_v33 }
 0xb16   :  { %v1379_v22 = vadd.f32 %v1371_v6, %v905_v33 }
 0xb17   :  { %1386 = vst [vmem:[#allocation5 + $0x70] sm:$0xff] %v1378_v37 }
 0xb18   :  { %1387 = vst [vmem:[#allocation5 + $0x78] sm:$0xff] %v1379_v22 }
 0xb19   :  { %1597 = shalt.err (!%p1594_p12)
}
 0xb1a   :  { %s1598_s17 = scalar_lea.hbm %s1971_s6, 2048 }
 0xb1b   :  { %p1599_p13 = scmp.ne.s32.totalorder %s1971_s6, %s1598_s17  ;;  %p1602_p0 = scmp.lt.u32.totalorder %s1598_s17, %s1971_s6 }
 0xb1d   :  { %p1604_p1 = pnand %p1602_p0, %p1599_p13 }
 0xb1f   :  { %1607 = shalt.err (!%p1604_p1)
}
 0xb20   :  { %1399 = dma.vmem_to_hbm [thread:$0]  %s1394_s13, 2048, %s1971_s6, [#allocation4], %s1613_s7, %s1613_s7, %s1614_s8  }
 0xb21   :  { %1610 = dma.done.wait [#allocation4], 2048  }
 0xb22   :  { %1611 = vsyncadd [#allocation4], 4294965248 }
 0xb23   :  { %1403 = vsyncpa [#allocation3], 1 }
 0xb24   :  { %1404 = vsyncpa [#allocation4], 1 }

</bundles_post_ra>
